<compile_context>
chip_gen: v7x
topology: tpu7x:2x2x1
jax: 0.10.0
libtpu: 0.0.40
codegen_flags: <defaults>
</compile_context>

<pallas_src>
import math
from functools import partial

import numpy as np
import jax
import jax.numpy as jnp
from jax.experimental import pallas as pl
from jax.experimental.pallas import tpu as pltpu

HIDDEN = 32
NUM_HEADS = 4
NUM_NODES_DEFAULT = 300      # PyG GraphMultisetTransformer default `num_nodes`
POOL_RATIO = 0.25            # default `pooling_ratio`


def _round_up(x, m):
    return ((x + m - 1) // m) * m


def _device_kind():
    try:
        return jax.devices()[0].device_kind.lower()
    except Exception:
        return ""


def _fast_bf16_elementwise():
    """bf16 EUP/VPU exists on v6e / v7x; keep f32 elementwise on v5e and older chips."""
    k = _device_kind()
    return ("v6" in k) or ("v7" in k)


def _fused_vmem_limit():
    """Raise the scoped-VMEM cap only where the physical budget is known."""
    k = _device_kind()
    if "v7" in k:
        return 48 * 1024 * 1024          # v7x: 64 MiB physical -> cap ~48 MiB
    if ("v5" in k) or ("v6" in k):
        return 96 * 1024 * 1024          # v5e/v6e: 128 MiB physical
    return None


# ----------------------------- tiled linear / matmul kernel -------------------

def _matmul_kernel(x_ref, w_ref, b_ref, o_ref, acc_ref):
    @pl.when(pl.program_id(1) == 0)
    def _():
        acc_ref[...] = jnp.zeros_like(acc_ref)

    acc_ref[...] += jnp.dot(x_ref[...].astype(jnp.bfloat16),
                            w_ref[...].astype(jnp.bfloat16),
                            preferred_element_type=jnp.float32)

    @pl.when(pl.program_id(1) == pl.num_programs(1) - 1)
    def _():
        o_ref[...] = acc_ref[...] + b_ref[...]


def pallas_linear(x, w, b=None, tm=1024, tk=2048):
    """y = x @ w + b.  Tiled over rows (M, parallel) and contraction (K, arbitrary)
    with an f32 VMEM accumulator; bf16 MXU operands, f32 accumulation."""
    M, K = x.shape
    N = w.shape[1]
    if b is None:
        b = jnp.zeros((N,), jnp.float32)
    bm = M if M <= tm else tm
    bk = K if K <= tk else tk
    Mp, Kp = _round_up(M, bm), _round_up(K, bk)
    xp = x if (Mp, Kp) == (M, K) else jnp.pad(x, ((0, Mp - M), (0, Kp - K)))
    wp = w if Kp == K else jnp.pad(w, ((0, Kp - K), (0, 0)))
    out = pl.pallas_call(
        _matmul_kernel,
        out_shape=jax.ShapeDtypeStruct((Mp, N), jnp.float32),
        grid=(Mp // bm, Kp // bk),
        in_specs=[pl.BlockSpec((bm, bk), lambda i, k: (i, k)),
                  pl.BlockSpec((bk, N), lambda i, k: (k, 0)),
                  pl.BlockSpec((1, N), lambda i, k: (0, 0))],
        out_specs=pl.BlockSpec((bm, N), lambda i, k: (i, 0)),
        scratch_shapes=[pltpu.VMEM((bm, N), jnp.float32)],
        compiler_params=pltpu.CompilerParams(
            dimension_semantics=("parallel", "arbitrary")),
    )(xp, wp, b.reshape(1, N))
    return out[:M] if Mp != M else out


# ----------------------------- fully fused GMT kernel -------------------------
# One grid step processes a block of `bt` graphs through all three MAB stages and lin2.

def _fused_gmt_kernel(num_heads, exp_dtype,
                      k1d_ref, v1d_ref, q1_ref, q3_ref,
                      wqkv2_ref, wkv3_ref, wo1_ref, wo2_ref, wo3_ref, w2_ref,
                      vec_ref, b2_ref, o_ref):
    f32, bf16 = jnp.float32, jnp.bfloat16
    H = wo1_ref.shape[0]
    A = w2_ref.shape[1]
    bt = k1d_ref.shape[0]
    k1 = q1_ref.shape[0]

    vec = vec_ref[...]                              # [3*8 + num_heads, H]
    headmask = vec[24:24 + num_heads]               # [nh, H] 0/1 masks (one per head)

    def sp(s):                                       # packed per-stage parameter rows
        b = 8 * s
        return (vec[b + 0:b + 1], vec[b + 1:b + 2], vec[b + 2:b + 3], vec[b + 3:b + 4],
                vec[b + 4:b + 5], vec[b + 5:b + 6], vec[b + 6:b + 7], vec[b + 7:b + 8])

    def layernorm(x, g, b, eps=1e-5):
        mu = jnp.mean(x, axis=-1, keepdims=True)
        var = jnp.mean((x - mu) ** 2, axis=-1, keepdims=True)
        return (x - mu) * jax.lax.rsqrt(var + eps) * g + b

    def attention(q, k, v):
        # q: [bt, nq, H] f32 (already fc_q-projected; 1/sqrt(H) folded into K);
        # k/v: [bt, nk, H].  Softmax over the QUERY axis (PyG GMT <=2.2 semantics).
        # Heads are full-width masked (no sub-vreg lane slices / concat); padded key
        # rows of V are exactly zero so no key mask is needed.
        kb, vb = k.astype(bf16), v.astype(bf16)
        acc = q                                     # residual: out = Q_ + sum_h P_h V (head h)
        for h in range(num_heads):
            m = headmask[h:h + 1]                   # [1, H]
            qh = (q * m).astype(bf16)
            s = jnp.einsum('bqc,bkc->bqk', qh, kb, preferred_element_type=f32)
            s = s - jnp.max(s, axis=1, keepdims=True)
            p = jnp.exp(s.astype(exp_dtype)).astype(f32)      # bf16 exp on v6e/v7x
            p = p * pl.reciprocal(jnp.sum(p, axis=1, keepdims=True), approx=True)
            oh = jnp.einsum('bqk,bkc->bqc', p.astype(bf16), vb,
                            preferred_element_type=f32)
            acc = acc + oh * m
        return acc

    def ffn_ln(o, wo_ref, o_b, g0, b0, g1, b1):
        o = layernorm(o, g0, b0)
        wo = jnp.broadcast_to(wo_ref[...].astype(bf16), (bt, H, H))
        ff = jnp.einsum('bqh,bhk->bqk', o.astype(bf16), wo,
                        preferred_element_type=f32) + o_b
        o = o + jnp.maximum(ff, 0.0)                # out + relu(fc_o(out))
        return layernorm(o, g1, b1)

    # ---- Stage 1: GMPool_G (75 seeds; K/V = GCNConv outputs, fully precomputed) ----
    _, _, _, ob1, g0, b0, g1, b1 = sp(0)
    q1 = jnp.broadcast_to(q1_ref[...], (bt, k1, H))            # pre-projected seed queries
    h1 = ffn_ln(attention(q1, k1d_ref[...], v1d_ref[...]), wo1_ref, ob1, g0, b0, g1, b1)

    # ---- Stage 2: SAB self-attention (fused [H,3H] QKV projection) ----
    qb2, kb2, vb2, ob2, g0, b0, g1, b1 = sp(1)
    wqkv2 = jnp.broadcast_to(wqkv2_ref[...].astype(bf16), (bt, H, 3 * H))
    qkv2 = jnp.einsum('bqh,bhk->bqk', h1.astype(bf16), wqkv2,
                      preferred_element_type=f32)
    q2 = qkv2[:, :, :H] + qb2
    k2 = qkv2[:, :, H:2 * H] + kb2
    v2 = qkv2[:, :, 2 * H:] + vb2
    h2 = ffn_ln(attention(q2, k2, v2), wo2_ref, ob2, g0, b0, g1, b1)

    # ---- Stage 3: GMPool_I (1 seed; Linear K/V, fused [H,2H] projection) ----
    _, kb3, vb3, ob3, g0, b0, g1, b1 = sp(2)
    wkv3 = jnp.broadcast_to(wkv3_ref[...].astype(bf16), (bt, H, 2 * H))
    kv3 = jnp.einsum('bqh,bhk->bqk', h2.astype(bf16), wkv3,
                     preferred_element_type=f32)
    k3 = kv3[:, :, :H] + kb3
    v3 = kv3[:, :, H:] + vb3
    q3 = jnp.broadcast_to(q3_ref[...], (bt, 1, H))
    h3 = ffn_ln(attention(q3, k3, v3), wo3_ref, ob3, g0, b0, g1, b1)   # [bt, 1, H]

    # ---- lin2 head fused into the same kernel ----
    w2 = jnp.broadcast_to(w2_ref[...].astype(bf16), (bt, H, A))
    out = jnp.einsum('bqh,bhk->bqk', h3.astype(bf16), w2,
                     preferred_element_type=f32) + b2_ref[...]
    o_ref[...] = out                                             # [bt, 1, A]


def pallas_gmt_fused(k1_dense, v1_dense, q1_pre, q3_pre, wqkv2, wkv3,
                     wo1, wo2, wo3, w2, vec, b2,
                     num_heads=NUM_HEADS, exp_dtype=jnp.float32,
                     graphs_per_step=32):
    """Fused GMT: three MAB stages + lin2 in one pallas_call, grid over graph blocks.
    On v7x pick graphs_per_step so Bp//bt is >=2 (megacore sharding of the grid)."""
    B, nmax, H = k1_dense.shape
    k1n = q1_pre.shape[0]
    A = w2.shape[1]

    bt = min(graphs_per_step, B)
    Bp = _round_up(B, bt)
    if Bp != B:
        # TODO(synk): handle the ragged tail in-kernel instead of re-materializing the
        # dense K/V through HBM with jnp.pad.
        pad = ((0, Bp - B), (0, 0), (0, 0))
        k1_dense = jnp.pad(k1_dense, pad)
        v1_dense = jnp.pad(v1_dense, pad)

    rep = lambda b: (0, 0)
    in_specs = [
        pl.BlockSpec((bt, nmax, H), lambda b: (b, 0, 0)),   # K (stage 1, bf16)
        pl.BlockSpec((bt, nmax, H), lambda b: (b, 0, 0)),   # V (stage 1, bf16)
        pl.BlockSpec((k1n, H), rep),                        # pre-projected seed Q (stage 1)
        pl.BlockSpec((1, H), rep),                          # pre-projected seed Q (stage 3)
        pl.BlockSpec((H, 3 * H), rep),                      # stage-2 fused QKV weight
        pl.BlockSpec((H, 2 * H), rep),                      # stage-3 fused KV weight
        pl.BlockSpec((H, H), rep),                          # fc_o stage 1
        pl.BlockSpec((H, H), rep),                          # fc_o stage 2
        pl.BlockSpec((H, H), rep),                          # fc_o stage 3
        pl.BlockSpec((H, A), rep),                          # lin2 weight
        pl.BlockSpec((vec.shape[0], H), rep),               # packed biases / LN / head masks
        pl.BlockSpec((1, A), rep),                          # lin2 bias
    ]

    cp = dict(dimension_semantics=("parallel",))
    vl = _fused_vmem_limit()
    if vl is not None:
        cp["vmem_limit_bytes"] = vl

    out = pl.pallas_call(
        partial(_fused_gmt_kernel, num_heads, exp_dtype),
        out_shape=jax.ShapeDtypeStruct((Bp, 1, A), jnp.float32),
        grid=(Bp // bt,),
        in_specs=in_specs,
        out_specs=pl.BlockSpec((bt, 1, A), lambda b: (b, 0, 0)),
        compiler_params=pltpu.CompilerParams(**cp),
    )(k1_dense, v1_dense, q1_pre, q3_pre, wqkv2, wkv3, wo1, wo2, wo3, w2, vec, b2)

    out = out[:, 0, :]
    return out[:B] if Bp != B else out


# ----------------------------- JAX glue (graph bookkeeping) -------------------

def gcn_norm_adj(edge_index, num_nodes):
    """Dense D^-1/2 (A + I) D^-1/2  (GCNConv default normalization)."""
    src, dst = edge_index[0], edge_index[1]
    loop = jnp.arange(num_nodes, dtype=src.dtype)
    src = jnp.concatenate([src, loop])
    dst = jnp.concatenate([dst, loop])
    w = jnp.ones(src.shape[0], jnp.float32)
    deg = jnp.zeros((num_nodes,), jnp.float32).at[dst].add(w)
    dinv = jnp.where(deg > 0, jax.lax.rsqrt(deg), 0.0)
    norm = dinv[src] * w * dinv[dst]
    return jnp.zeros((num_nodes, num_nodes), jnp.float32).at[dst, src].add(norm)


def to_dense_batch(x, batch, num_graphs, max_nodes):
    n = x.shape[0]
    counts = jnp.zeros((num_graphs,), jnp.int32).at[batch].add(1)
    ptr = jnp.concatenate([jnp.zeros((1,), jnp.int32), jnp.cumsum(counts)[:-1]])
    pos = jnp.arange(n, dtype=jnp.int32) - ptr[batch]
    dense = jnp.zeros((num_graphs, max_nodes, x.shape[1]), x.dtype).at[batch, pos].set(x)
    mask = jnp.zeros((num_graphs, max_nodes), jnp.bool_).at[batch, pos].set(True)
    return dense, mask


# ----------------------------- parameters --------------------------------------

def init_params(key, num_node_features, n_actions, hidden=HIDDEN):
    state = {"key": key}

    def w(shape, scale=0.1):
        state["key"], sub = jax.random.split(state["key"])
        return scale * jax.random.normal(sub, shape, jnp.float32)

    def mab_params():
        return dict(
            fc_q_w=w((hidden, hidden)), fc_q_b=w((hidden,)),
            k_w=w((hidden, hidden)), k_b=w((hidden,)),
            v_w=w((hidden, hidden)), v_b=w((hidden,)),
            fc_o_w=w((hidden, hidden)), fc_o_b=w((hidden,)),
            ln0_g=1.0 + w((hidden,)), ln0_b=w((hidden,)),
            ln1_g=1.0 + w((hidden,)), ln1_b=w((hidden,)),
        )

    k1 = math.ceil(NUM_NODES_DEFAULT * POOL_RATIO)   # 75 seeds for the first PMA
    params = dict(
        lin1_w=w((num_node_features, hidden)), lin1_b=w((hidden,)),
        lin2_w=w((hidden, n_actions)), lin2_b=w((n_actions,)),
        S1=w((1, k1, hidden)), mab1=mab_params(),        # GMPool_G (GCNConv K/V)
        mab2=mab_params(),                               # SelfAtt
        S3=w((1, 1, hidden)), mab3=mab_params(),         # GMPool_I (Linear K/V, 1 seed)
    )
    return params, k1


# ----------------------------- forward ------------------------------------------

def gmt_forward(params, x, edge_index, batch, num_graphs, max_nodes,
                hidden=HIDDEN, num_heads=NUM_HEADS, graphs_per_step=32):
    H = hidden
    d = H // num_heads
    scale = 1.0 / math.sqrt(H)           # GMT divides by sqrt(dim_V); folded into the K path
    m1, m2, m3 = params['mab1'], params['mab2'], params['mab3']
    n_total = x.shape[0]

    # ---- Stage-1 K/V (GCNConv) precomputed as flat matmuls, lin1 folded in ----
    # GCNConv(lin1(x)) = A_norm @ (lin1(x) @ Wkv) + bkv = A_norm @ (x @ (W1 Wkv) + b1 Wkv) + bkv.
    # The bias is added per *valid* node BEFORE to_dense_batch -> padded rows are exactly zero,
    # matching PyG (and making the -1e9 key mask / any in-kernel mask unnecessary).
    wkv1 = jnp.concatenate([m1['k_w'] * scale, m1['v_w']], axis=1)        # [H, 2H]
    bkv1 = jnp.concatenate([m1['k_b'] * scale, m1['v_b']])                # [2H]
    w1kv = params['lin1_w'] @ wkv1                                        # [F, 2H]
    c1kv = params['lin1_b'] @ wkv1                                        # [2H]
    t = x @ w1kv + c1kv                                                   # [N, 2H]  (tiny K=F: XLA)

    a_norm = gcn_norm_adj(edge_index, n_total)                            # [N, N]
    # TODO(synk): for large graphs replace the dense O(N^2) adjacency with a sparse segment-sum.
    kv_nodes = pallas_linear(a_norm, t, bkv1)                             # [N, 2H] = A_norm@t + bkv
    kv_dense, _ = to_dense_batch(kv_nodes, batch, num_graphs, max_nodes)  # [B, Nmax, 2H]
    k1_dense = kv_dense[..., :H].astype(jnp.bfloat16)                     # bf16 HBM->VMEM stream
    v1_dense = kv_dense[..., H:].astype(jnp.bfloat16)

    # ---- batch-invariant seed-query projections (hoisted out of the kernel) ----
    q1_pre = params['S1'][0] @ m1['fc_q_w'] + m1['fc_q_b']                # [75, H]
    q3_pre = params['S3'][0] @ m3['fc_q_w'] + m3['fc_q_b']                # [1, H]

    # ---- fused per-stage weights (1/sqrt(H) folded into the K columns) ----
    wqkv2 = jnp.concatenate([m2['fc_q_w'], m2['k_w'] * scale, m2['v_w']], axis=1)  # [H, 3H]
    wkv3 = jnp.concatenate([m3['k_w'] * scale, m3['v_w']], axis=1)                 # [H, 2H]

    # ---- packed bias / LayerNorm / head-mask tile (rows of width H) ----
    z = jnp.zeros((H,), jnp.float32)
    rows = [
        # stage 1 (q/k/v biases unused: q pre-projected, GCN bias baked into producer)
        z, z, z, m1['fc_o_b'], m1['ln0_g'], m1['ln0_b'], m1['ln1_g'], m1['ln1_b'],
        # stage 2
        m2['fc_q_b'], m2['k_b'] * scale, m2['v_b'], m2['fc_o_b'],
        m2['ln0_g'], m2['ln0_b'], m2['ln1_g'], m2['ln1_b'],
        # stage 3 (q bias unused: q pre-projected)
        z, m3['k_b'] * scale, m3['v_b'], m3['fc_o_b'],
        m3['ln0_g'], m3['ln0_b'], m3['ln1_g'], m3['ln1_b'],
    ]
    lane = jnp.arange(H)
    rows += [((lane >= h * d) & (lane < (h + 1) * d)).astype(jnp.float32)
             for h in range(num_heads)]
    vec = jnp.stack(rows)                                                 # [24 + heads, H]

    exp_dtype = jnp.bfloat16 if _fast_bf16_elementwise() else jnp.float32

    return pallas_gmt_fused(
        k1_dense, v1_dense, q1_pre, q3_pre, wqkv2, wkv3,
        m1['fc_o_w'], m2['fc_o_w'], m3['fc_o_w'],
        params['lin2_w'], vec, params['lin2_b'].reshape(1, -1),
        num_heads=num_heads, exp_dtype=exp_dtype, graphs_per_step=graphs_per_step)


# ----------------------------- main ----------------------------------------------

if __name__ == "__main__":
    F_IN = 8          # num_node_features
    N_ACTIONS = 6     # n_actions
    nodes_per_graph = [7, 5]
    B = len(nodes_per_graph)
    N_TOTAL = sum(nodes_per_graph)
    N_MAX = max(nodes_per_graph)

    key = jax.random.PRNGKey(0)
    kx, kp = jax.random.split(key)
    x = jax.random.normal(kx, (N_TOTAL, F_IN), jnp.float32)

    # Undirected chain per graph, stored as directed edges in both directions.
    edges = []
    off = 0
    for n in nodes_per_graph:
        for i in range(n - 1):
            edges.append((off + i, off + i + 1))
            edges.append((off + i + 1, off + i))
        off += n
    edge_index = jnp.asarray(np.array(edges, dtype=np.int32).T)        # [2, E]
    batch = jnp.asarray(np.repeat(np.arange(B), nodes_per_graph).astype(np.int32))

    params, k1 = init_params(kp, F_IN, N_ACTIONS)

    out = gmt_forward(params, x, edge_index, batch, B, N_MAX)
    out = jax.block_until_ready(out)

    assert out.shape == (B, N_ACTIONS), out.shape
    assert bool(jnp.all(jnp.isfinite(out)))
    print("KERNEL_OK")
</pallas_src>

<mosaic_0001>
module attributes {stable_mosaic.version = 11 : i64} {
  func.func @_matmul_kernel(%arg0: i32, %arg1: i32, %arg2: memref<12x12xf32, #tpu.memory_space<vmem>>, %arg3: memref<12x64xf32, #tpu.memory_space<vmem>>, %arg4: memref<1x64xf32, #tpu.memory_space<vmem>>, %arg5: memref<12x64xf32, #tpu.memory_space<vmem>>, %arg6: memref<12x64xf32, #tpu.memory_space<vmem>>) attributes {dimension_semantics = [#tpu.dimension_semantics<parallel>, #tpu.dimension_semantics<arbitrary>], iteration_bounds = array<i64: 1, 1>, scalar_prefetch = 0 : i64, scratch_operands = 1 : i64, tpu.core_type = #tpu.core_type<tc>, window_params = [{transform_indices = @transform_0, window_bounds = array<i64: 12, 12>}, {transform_indices = @transform_1, window_bounds = array<i64: 12, 64>}, {pipeline_mode = #tpu.pipeline_mode<synchronous>, transform_indices = @transform_2, window_bounds = array<i64: 1, 64>}, {transform_indices = @transform_3, window_bounds = array<i64: 12, 64>}]} {
    %c0_i32 = arith.constant 0 : i32
    %0 = arith.cmpi eq, %arg1, %c0_i32 : i32
    %1 = arith.extui %0 : i1 to i32
    %c0_i32_0 = arith.constant 0 : i32
    %2 = arith.cmpi ne, %1, %c0_i32_0 : i32
    scf.if %2 {
      %cst_10 = arith.constant 0.000000e+00 : f32
      %14 = vector.broadcast %cst_10 : f32 to vector<12x64xf32>
      %c0_11 = arith.constant 0 : index
      %c0_12 = arith.constant 0 : index
      %15 = vector.load %arg6[%c0_11, %c0_12] : memref<12x64xf32, #tpu.memory_space<vmem>>, vector<12x64xf32>
      tpu.vector_store %arg6[%c0_11, %c0_12], %14 {strides = array<i32>} : memref<12x64xf32, #tpu.memory_space<vmem>>, vector<12x64xf32>,
    } else {
    }
    %c0 = arith.constant 0 : index
    %c0_1 = arith.constant 0 : index
    %3 = vector.load %arg6[%c0, %c0_1] : memref<12x64xf32, #tpu.memory_space<vmem>>, vector<12x64xf32>
    %c0_2 = arith.constant 0 : index
    %c0_3 = arith.constant 0 : index
    %4 = vector.load %arg2[%c0_2, %c0_3] : memref<12x12xf32, #tpu.memory_space<vmem>>, vector<12x12xf32>
    %5 = arith.truncf %4 : vector<12x12xf32> to vector<12x12xbf16>
    %c0_4 = arith.constant 0 : index
    %c0_5 = arith.constant 0 : index
    %6 = vector.load %arg3[%c0_4, %c0_5] : memref<12x64xf32, #tpu.memory_space<vmem>>, vector<12x64xf32>
    %7 = arith.truncf %6 : vector<12x64xf32> to vector<12x64xbf16>
    %cst = arith.constant dense<0.000000e+00> : vector<12x64xf32>
    %8 = tpu.matmul %5, %7, %cst {dimension_numbers = #tpu.dot_dimension_numbers<[1], [0], [0], [1], [0, 0, 1, 1], [], []>} : vector<12x12xbf16>, vector<12x64xbf16>, vector<12x64xf32> -> vector<12x64xf32>
    %9 = arith.addf %3, %8 : vector<12x64xf32>
    %c0_6 = arith.constant 0 : index
    %c0_7 = arith.constant 0 : index
    %10 = vector.load %arg6[%c0_6, %c0_7] : memref<12x64xf32, #tpu.memory_space<vmem>>, vector<12x64xf32>
    tpu.vector_store %arg6[%c0_6, %c0_7], %9 {strides = array<i32>} : memref<12x64xf32, #tpu.memory_space<vmem>>, vector<12x64xf32>,
    %c0_i32_8 = arith.constant 0 : i32
    %11 = arith.cmpi eq, %arg1, %c0_i32_8 : i32
    %12 = arith.extui %11 : i1 to i32
    %c0_i32_9 = arith.constant 0 : i32
    %13 = arith.cmpi ne, %12, %c0_i32_9 : i32
    scf.if %13 {
      %c0_10 = arith.constant 0 : index
      %c0_11 = arith.constant 0 : index
      %14 = vector.load %arg6[%c0_10, %c0_11] : memref<12x64xf32, #tpu.memory_space<vmem>>, vector<12x64xf32>
      %c0_12 = arith.constant 0 : index
      %c0_13 = arith.constant 0 : index
      %15 = vector.load %arg4[%c0_12, %c0_13] : memref<1x64xf32, #tpu.memory_space<vmem>>, vector<1x64xf32>
      %16 = vector.broadcast %15 : vector<1x64xf32> to vector<12x64xf32>
      %17 = arith.addf %14, %16 : vector<12x64xf32>
      %c0_14 = arith.constant 0 : index
      %c0_15 = arith.constant 0 : index
      %18 = vector.load %arg5[%c0_14, %c0_15] : memref<12x64xf32, #tpu.memory_space<vmem>>, vector<12x64xf32>
      tpu.vector_store %arg5[%c0_14, %c0_15], %17 {strides = array<i32>} : memref<12x64xf32, #tpu.memory_space<vmem>>, vector<12x64xf32>,
    } else {
    }
    return
  }
  func.func @transform_0(%arg0: i32, %arg1: i32) -> (i32, i32) {
    %c0_i32 = arith.constant 0 : i32
    return %arg0, %arg1 : i32, i32
  }
  func.func @transform_1(%arg0: i32, %arg1: i32) -> (i32, i32) {
    %c0_i32 = arith.constant 0 : i32
    %c0_i32_0 = arith.constant 0 : i32
    return %arg1, %c0_i32 : i32, i32
  }
  func.func @transform_2(%arg0: i32, %arg1: i32) -> (i32, i32) {
    %c0_i32 = arith.constant 0 : i32
    %c0_i32_0 = arith.constant 0 : i32
    %c0_i32_1 = arith.constant 0 : i32
    return %c0_i32, %c0_i32_0 : i32, i32
  }
  func.func @transform_3(%arg0: i32, %arg1: i32) -> (i32, i32) {
    %c0_i32 = arith.constant 0 : i32
    %c0_i32_0 = arith.constant 0 : i32
    return %arg0, %c0_i32 : i32, i32
  }
}

</mosaic_0001>

<bundles_post_ra>
// kernel: tpu_custom_call.1
= control target key start
LH: loop header
LB: loop body
LE: loop exit
PB: predicated region body
PF: predicated region fallthrough
CT: control target
= control target key end

     0   :  { %8 = vsyncpa [#allocation4], 0  ;;  %s319_s0 = inlined_call_operand.hbm [shape: f32[12,12], index: 0, kind: input, shape index: {}]   ;;  %s320_s1 = inlined_call_operand.hbm [shape: f32[12,64], index: 1, kind: input, shape index: {}]   ;;  %s321_s2 = inlined_call_operand.vmem [shape: f32[1,64], index: 2, kind: input, shape index: {}]   ;;  %s322_s3 = inlined_call_operand.hbm [shape: f32[12,64], index: 3, kind: output, shape index: {}]  }
   0x1   :  { %9 = vsyncpa [#allocation7], 0 }
   0x2   :  { %10 = vsyncpa [#allocation5], 0  ;;  %s238_s12 = smov [#allocation3]   ;;  %s166_s16 = scalar_lea.hbm %s319_s0, 256 }
   0x3   :  { %s16_s13 = sshll.u32 %s238_s12, 4  ;;  %p167_p0 = scmp.ne.s32.totalorder %s319_s0, %s166_s16  ;;  %s17_s13 = int_to_ptr.vmem [resolvable:$true] %s16_s13 }
   0x4   :  { %p170_p1 = scmp.lt.u32.totalorder %s166_s16, %s319_s0 }
   0x6   :  { %p172_p2 = pnand %p170_p1, %p167_p0 }
   0x8   :  { %175 = shalt.err (!%p172_p2)
}
   0x9   :  { %s176_s21 = scalar_lea.vmem %s17_s13, 256  ;;  %p181_p4 = scmp.lt.s32.totalorder %s17_s13, %s17_s13 }
   0xa   :  { %p177_p3 = scmp.ne.s32.totalorder %s17_s13, %s176_s21  ;;  %p182_p5 = scmp.lt.s32.totalorder %s176_s21, %s176_s21 }
   0xc   :  { %p183_p6 = por %p182_p5, %p181_p4 }
   0xe   :  { %p184_p7 = pnand %p183_p6, %p177_p3 }
  0x10   :  { %187 = shalt.err (!%p184_p7)
}
  0x11   :  { %s239_s22 = smov 128   ;;  %s240_s23 = smov 8  }
  0x12   :  { %22 = dma.hbm_to_vmem [thread:$0]  %s319_s0, 256, %s17_s13, [#allocation4], %s239_s22, %s239_s22, %s240_s23  }
  0x13   :  { %s241_s26 = smov [#allocation6]   ;;  %s188_s30 = scalar_lea.hbm %s320_s1, 256 }
  0x14   :  { %s28_s27 = sshll.u32 %s241_s26, 4  ;;  %p189_p8 = scmp.ne.s32.totalorder %s320_s1, %s188_s30  ;;  %s29_s27 = int_to_ptr.vmem [resolvable:$true] %s28_s27 }
  0x15   :  { %p192_p9 = scmp.lt.u32.totalorder %s188_s30, %s320_s1 }
  0x17   :  { %p194_p10 = pnand %p192_p9, %p189_p8 }
  0x19   :  { %197 = shalt.err (!%p194_p10)
}
  0x1a   :  { %s198_s8 = scalar_lea.vmem %s29_s27, 256  ;;  %p203_p12 = scmp.lt.s32.totalorder %s29_s27, %s29_s27 }
  0x1b   :  { %p199_p11 = scmp.ne.s32.totalorder %s29_s27, %s198_s8  ;;  %p204_p13 = scmp.lt.s32.totalorder %s198_s8, %s198_s8 }
  0x1d   :  { %p205_p0 = por %p204_p13, %p203_p12 }
  0x1f   :  { %p206_p1 = pnand %p205_p0, %p199_p11 }
  0x21   :  { %209 = shalt.err (!%p206_p1)
}
  0x22   :  { %34 = dma.hbm_to_vmem [thread:$0]  %s320_s1, 256, %s29_s27, [#allocation7], %s239_s22, %s239_s22, %s240_s23  }
  0x23   :  { %232 = dma.done.wait [#allocation4], 256  }
  0x24   :  { %233 = vsyncadd [#allocation4], 4294967040 }
  0x25   :  { %234 = dma.done.wait [#allocation7], 256  }
  0x26   :  { %235 = vsyncadd [#allocation7], 4294967040  ;;  %v242_v0 = vmov 0.0   ;;  %vm243_vm0 = vmmov 0   ;;  %vm48_vm1 = vcmask 523264   ;;  %v57_v1 = vld [vmem:[#allocation6] sm:$0xff] }
  0x27   :  { %153 = vmatprep.subr.bf16.mxu0 %v242_v0  ;;  %155 = vmatprep.mubr.msk.bf16.mxu0 %vm243_vm0, %v242_v0  ;;  %49 = vst.msk [vmem:[#allocation2] sm:$0xff] %vm48_vm1, %v242_v0  ;;  %v58_v2 = vld [vmem:[#allocation6 + $0x8] sm:$0xf]  ;;  %vm64_vm2 = vcmask 1045504   ;;  %v54_v3 = vld [vmem:[#allocation3] sm:$0xff]  ;;  %vm60_vm3 = vcmask 97280  }
  0x28   :  { %v59_v4 = vpack.c.bf16 %v58_v2, %v57_v1  ;;  %v55_v5 = vld [vmem:[#allocation3 + $0x8] sm:$0xf]  ;;  %vm50_vm4 = vcmask 519168   ;;  %v150_v16 = vld [vmem:[%s321_s2] ss:$0 sm:$0xff]  ;;  %s244_s11 = smov [#allocation8]  }
  0x29   :  { %v56_v7 = vpack.c.bf16 %v55_v5, %v54_v3  ;;  %51 = vst.msk [vmem:[#allocation2 + $0x8] sm:$0xf] %vm50_vm4, %v242_v0  ;;  %s136_s12 = sshll.u32 %s244_s11, 4  ;;  %s137_s12 = int_to_ptr.vmem [resolvable:$true] %s136_s12 }
  0x2a   :  { %v66_v6 = vsel %vm64_vm2, %v59_v4, 0  ;;  %s210_s13 = scalar_lea.vmem %s137_s12, 256  ;;  %p215_p3 = scmp.lt.s32.totalorder %s137_s12, %s137_s12 }
  0x2b   :  { %154 = vmatpush3.bf16.msra.mxu0 %v66_v6  ;;  %p211_p2 = scmp.ne.s32.totalorder %s137_s12, %s210_s13  ;;  %p216_p4 = scmp.lt.s32.totalorder %s210_s13, %s210_s13 }
  0x2d   :  { %p217_p5 = por %p216_p4, %p215_p3 }
  0x2e   :  { %156 = vmatmul.mubr.msk.bf16.vlgmr.msra.gmra.mrb[0].mxu0 %vm60_vm3, %v56_v7  ;;  %v52_v8 = vld [vmem:[#allocation2] sm:$0xff] }
  0x2f   :  { %p218_p6 = pnand %p217_p5, %p211_p2 }
  0x30   :  { %v53_v10 = vld [vmem:[#allocation2 + $0x8] sm:$0xf] }
 0x101   :  { %v102_v9 = vpop.f32.mrb[0].mxu0 }
 0x102   :  { %v109_v11 = vadd.f32 %v102_v9, %v52_v8  ;;  %v157_v12 = vpop.f32.mrb[1].mxu0 }
 0x103   :  { %v105_v13 = vpop.f32.mrb[2].mxu0 }
 0x104   :  { %112 = vst.msk [vmem:[#allocation2] sm:$0xff] %vm48_vm1, %v109_v11  ;;  %v110_v14 = vadd.f32 %v105_v13, %v53_v10  ;;  %v158_v15 = vpop.f32.mrb[3].mxu0 }
 0x106   :  { %114 = vst.msk [vmem:[#allocation2 + $0x8] sm:$0xf] %vm50_vm4, %v110_v14 }
 0x10b   :  { %v118_v17 = vld [vmem:[#allocation2] sm:$0xff] }
 0x10c   :  { %v127_v18 = vadd.f32 %v150_v16, %v118_v17 }
 0x10d   :  { %v119_v19 = vld [vmem:[#allocation2 + $0x8] sm:$0xf] }
 0x10e   :  { %v128_v20 = vadd.f32 %v150_v16, %v119_v19  ;;  %129 = vst.msk [vmem:[#allocation8] sm:$0xff] %vm48_vm1, %v127_v18 }
 0x110   :  { %130 = vst.msk [vmem:[#allocation8 + $0x8] sm:$0xf] %vm50_vm4, %v128_v20 }
 0x111   :  { %221 = shalt.err (!%p218_p6)
}
 0x112   :  { %s222_s15 = scalar_lea.hbm %s322_s3, 256 }
 0x113   :  { %p223_p7 = scmp.ne.s32.totalorder %s322_s3, %s222_s15  ;;  %p226_p8 = scmp.lt.u32.totalorder %s222_s15, %s322_s3 }
 0x115   :  { %p228_p9 = pnand %p226_p8, %p223_p7 }
 0x117   :  { %231 = shalt.err (!%p228_p9)
}
 0x118   :  { %142 = dma.vmem_to_hbm [thread:$0]  %s137_s12, 256, %s322_s3, [#allocation5], %s239_s22, %s239_s22, %s240_s23  }
 0x119   :  { %236 = dma.done.wait [#allocation5], 256  }
 0x11a   :  { %237 = vsyncadd [#allocation5], 4294967040 }
 0x11b   :  { %146 = vsyncpa [#allocation4], 1 }
 0x11c   :  { %147 = vsyncpa [#allocation7], 1 }
 0x11d   :  { %148 = vsyncpa [#allocation5], 1 }

</bundles_post_ra>
